<compile_context>
chip_gen: v5e
topology: v5e:2x2
jax: 0.10.0
libtpu: 0.0.40
codegen_flags: <defaults>
</compile_context>

<pallas_src>
import jax
import jax.numpy as jnp
from jax.experimental import pallas as pl
from jax.experimental.pallas import tpu as pltpu


def _silu_quadsum_kernel(x_ref, a_ref, o_ref):
    # z = SiLU(x @ A): MXU matmul (f32 accumulate), SiLU on VPU/EUP.
    z = jnp.dot(x_ref[...], a_ref[...], preferred_element_type=jnp.float32)
    z = z * jax.nn.sigmoid(z)
    # Quadrant reduction: out[:, c*na + j] = sum_k z[:, (4c + k)*na + j].
    # 12 slice-adds on the VPU (lane-aligned when na % 128 == 0) instead of a
    # second full-size selection-matrix matmul.
    na = o_ref.shape[-1] // 4
    parts = []
    for c in range(4):
        base = 4 * c * na
        acc = z[:, base:base + na]
        for k in range(1, 4):
            acc = acc + z[:, base + k * na: base + (k + 1) * na]
        parts.append(acc)
    o_ref[...] = jnp.concatenate(parts, axis=1)


def _glue_kernel(g_ref, f_ref):
    # Per output matrix m: build K, square, symmetrize, Laplacian diagonal.
    g = g_ref[0]                                   # (na, 4na) = [R11|R12|R21|R22]
    na = g.shape[0]
    n2 = 2 * na
    # K = [[R11, R12], [R21, R22]]: two contiguous lane slices stacked on sublanes.
    K = jnp.concatenate([g[:, :n2], g[:, n2:]], axis=0)        # (2na, 2na)
    K2 = K * K
    S = K2 + K2.T                                              # XLU transpose
    rowsum = jnp.sum(S, axis=1, keepdims=True)                 # (2na, 1)
    i_idx = jax.lax.broadcasted_iota(jnp.int32, (n2, n2), 0)
    j_idx = jax.lax.broadcasted_iota(jnp.int32, (n2, n2), 1)
    F = jnp.where(i_idx == j_idx, rowsum, -S)                  # Laplacian-like
    f_ref[...] = F[None]


def _round_up(v, m):
    return -(-v // m) * m


def mlp_r_forward(x, A, *, tb=512, use_bf16=True, expand=True,
                  vmem_budget_bytes=40 << 20):
    """x: (B, d); A: (d, h) with h == 4*d (== 16*na, na = d // 4)."""
    B, d = x.shape
    h = A.shape[1]
    assert d % 4 == 0, "MLP_R requires d % 4 == 0"
    na = d // 4
    assert h == 16 * na, "MLP_R requires h == 4*d (equivalently 16*na)"
    assert B % na == 0, "MLP_R requires batch divisible by na"
    M = B // na

    if use_bf16:
        # bf16-native MXU path; accumulation stays f32.
        x_in, A_in = x.astype(jnp.bfloat16), A.astype(jnp.bfloat16)
    else:
        x_in, A_in = x.astype(jnp.float32), A.astype(jnp.float32)
    x_bytes = x_in.dtype.itemsize
    a_bytes = A_in.dtype.itemsize

    # ---- kernel 1 tiling: VMEM-budgeted tile, padded ragged batch (no tb=B). --
    tb = max(8, min(_round_up(B, 8), (tb // 8) * 8))

    def vmem_est(t):
        a_res = 2 * d * h * a_bytes            # resident A (double-buffered)
        x_buf = 2 * t * d * x_bytes            # x tile, double-buffered
        o_buf = 2 * t * 4 * na * 4             # out tile, double-buffered
        z_tmp = 3 * t * h * 4                  # z + SiLU / group-sum temps
        return a_res + x_buf + o_buf + z_tmp

    while tb > 8 and vmem_est(tb) > vmem_budget_bytes:
        tb = max(8, ((tb // 2) // 8) * 8)
    n_tiles = max(1, -(-B // tb))              # even split over the grid
    tb = _round_up(-(-B // n_tiles), 8)
    Bp = n_tiles * tb
    if Bp != B:
        x_in = jnp.pad(x_in, ((0, Bp - B), (0, 0)))
    vmem_limit_1 = min(int(vmem_est(tb) * 1.25) + (2 << 20), 64 << 20)

    g = pl.pallas_call(
        _silu_quadsum_kernel,
        out_shape=jax.ShapeDtypeStruct((Bp, 4 * na), jnp.float32),
        grid_spec=pltpu.PrefetchScalarGridSpec(
            num_scalar_prefetch=0,
            grid=(n_tiles,),
            in_specs=[
                pl.BlockSpec((tb, d), lambda i: (i, 0)),      # x tile
                pl.BlockSpec((d, h), lambda i: (0, 0)),       # A resident
            ],
            out_specs=pl.BlockSpec((tb, 4 * na), lambda i: (i, 0)),
        ),
        compiler_params=pltpu.CompilerParams(
            dimension_semantics=("parallel",),
            vmem_limit_bytes=vmem_limit_1),
    )(x_in, A_in)

    # (B, 4na) -> (M, na, 4na): free reshape; lets kernel-2 blocks equal the
    # full trailing dims (valid even when na is not a multiple of 8).
    g = g[:B].reshape(M, na, 4 * na)

    # ---- kernel 2: fused glue per output matrix (K / K^2 / S never hit HBM). --
    glue_tmp = 12 * (2 * na) * (2 * na) * 4 + 2 * (na * 4 * na * 4)
    vmem_limit_2 = min(max(32 << 20, 2 * glue_tmp), 64 << 20)
    F = pl.pallas_call(
        _glue_kernel,
        out_shape=jax.ShapeDtypeStruct((M, 2 * na, 2 * na), jnp.float32),
        grid_spec=pltpu.PrefetchScalarGridSpec(
            num_scalar_prefetch=0,
            grid=(M,),
            in_specs=[pl.BlockSpec((1, na, 4 * na), lambda m: (m, 0, 0))],
            out_specs=pl.BlockSpec((1, 2 * na, 2 * na), lambda m: (m, 0, 0)),
        ),
        compiler_params=pltpu.CompilerParams(
            dimension_semantics=("parallel",),
            vmem_limit_bytes=vmem_limit_2),
    )(g)

    if not expand:
        # Compact (M, 2na, 2na); downstream can apply kron(., I2) implicitly.
        return F

    # kron(F, I2): out[m, 2s+a, 2t+b] = F[m, s, t] * (a == b)  (single XLA op).
    eye2 = jnp.eye(2, dtype=F.dtype)
    out = (F[:, :, None, :, None] * eye2[None, None, :, None, :]).reshape(
        M, 4 * na, 4 * na)
    return out


def _reference(x, A):
    # Pure-JAX mirror of the torch forward, for correctness checks.
    B, d = x.shape
    na = d // 4
    M = B // na
    z = x @ A
    z = z * jax.nn.sigmoid(z)
    R = z.reshape(B, 16, na)
    R11 = R[:, 0:4].sum(1).reshape(M, na, na)
    R12 = R[:, 4:8].sum(1).reshape(M, na, na)
    R21 = R[:, 8:12].sum(1).reshape(M, na, na)
    R22 = R[:, 12:16].sum(1).reshape(M, na, na)
    eye2 = jnp.eye(2, dtype=x.dtype)

    def kron2(X):
        return jnp.einsum("mij,ab->miajb", X, eye2).reshape(M, 2 * na, 2 * na)

    K11, K12, K21, K22 = kron2(R11), kron2(R12), kron2(R21), kron2(R22)
    Rb = jnp.concatenate(
        [jnp.concatenate([K11, K21], axis=1),
         jnp.concatenate([K12, K22], axis=1)], axis=2)
    Rb = Rb ** 2
    Rupper = Rb + jnp.swapaxes(Rb, 1, 2)
    n = 4 * na
    idx = jnp.arange(n)
    Rdiag = Rupper.at[:, idx, idx].set(0.0)
    eyeN = jnp.eye(n, dtype=x.dtype)
    Rout = eyeN[None] * Rupper
    return Rout + eyeN[None] * jnp.sum(Rdiag, 2)[:, :, None] - Rdiag


if __name__ == "__main__":
    # Small, module-consistent shapes: d = 16 -> na = 4, h = 4*d = 64,
    # batch B = M * na = 32 (M = 8 output matrices of size 16x16).
    d = 16
    na = d // 4
    h = 4 * d
    M = 8
    B = M * na

    key = jax.random.PRNGKey(0)
    kx, ka = jax.random.split(key)
    x = jax.random.normal(kx, (B, d), dtype=jnp.float32)
    A = 0.01 * jax.random.normal(ka, (d, h), dtype=jnp.float32)

    R_ref = _reference(x, A)

    # f32 path: tight tolerance vs. the pure-JAX reference.
    R32 = jax.block_until_ready(mlp_r_forward(x, A, use_bf16=False))
    assert R32.shape == (M, 4 * na, 4 * na)
    assert jnp.allclose(R32, R_ref, atol=1e-5, rtol=1e-4)

    # default bf16-input path (f32 accumulation): looser tolerance.
    Rbf = jax.block_until_ready(mlp_r_forward(x, A))
    assert Rbf.shape == (M, 4 * na, 4 * na)
    assert jnp.allclose(Rbf, R_ref, atol=5e-4, rtol=5e-2)

    print("KERNEL_OK")
</pallas_src>

<mosaic_0001>
module attributes {stable_mosaic.version = 11 : i64} {
  func.func @_silu_quadsum_kernel(%arg0: i32, %arg1: memref<32x16xf32, #tpu.memory_space<vmem>>, %arg2: memref<16x64xf32, #tpu.memory_space<vmem>>, %arg3: memref<32x16xf32, #tpu.memory_space<vmem>>) attributes {dimension_semantics = [#tpu.dimension_semantics<parallel>], iteration_bounds = array<i64: 1>, scalar_prefetch = 0 : i64, scratch_operands = 0 : i64, tpu.core_type = #tpu.core_type<tc>, window_params = [{transform_indices = @transform_0, window_bounds = array<i64: 32, 16>}, {pipeline_mode = #tpu.pipeline_mode<synchronous>, transform_indices = @transform_1, window_bounds = array<i64: 16, 64>}, {transform_indices = @transform_2, window_bounds = array<i64: 32, 16>}]} {
    %c0 = arith.constant 0 : index
    %c0_0 = arith.constant 0 : index
    %0 = vector.load %arg1[%c0, %c0_0] : memref<32x16xf32, #tpu.memory_space<vmem>>, vector<32x16xf32>
    %c0_1 = arith.constant 0 : index
    %c0_2 = arith.constant 0 : index
    %1 = vector.load %arg2[%c0_1, %c0_2] : memref<16x64xf32, #tpu.memory_space<vmem>>, vector<16x64xf32>
    %cst = arith.constant dense<0.000000e+00> : vector<32x64xf32>
    %2 = tpu.matmul %0, %1, %cst {dimension_numbers = #tpu.dot_dimension_numbers<[1], [0], [0], [1], [0, 0, 1, 1], [], []>} : vector<32x16xf32>, vector<16x64xf32>, vector<32x64xf32> -> vector<32x64xf32>
    %3 = arith.negf %2 : vector<32x64xf32>
    %4 = math.exp %3 : vector<32x64xf32>
    %cst_3 = arith.constant 1.000000e+00 : f32
    %5 = vector.broadcast %cst_3 : f32 to vector<32x64xf32>
    %6 = arith.addf %5, %4 : vector<32x64xf32>
    %7 = arith.divf %5, %6 : vector<32x64xf32>
    %8 = arith.mulf %2, %7 : vector<32x64xf32>
    %9 = vector.extract_strided_slice %8 {offsets = [0, 0], sizes = [32, 4], strides = [1, 1]} : vector<32x64xf32> to vector<32x4xf32>
    %10 = vector.extract_strided_slice %8 {offsets = [0, 4], sizes = [32, 4], strides = [1, 1]} : vector<32x64xf32> to vector<32x4xf32>
    %11 = arith.addf %9, %10 : vector<32x4xf32>
    %12 = vector.extract_strided_slice %8 {offsets = [0, 8], sizes = [32, 4], strides = [1, 1]} : vector<32x64xf32> to vector<32x4xf32>
    %13 = arith.addf %11, %12 : vector<32x4xf32>
    %14 = vector.extract_strided_slice %8 {offsets = [0, 12], sizes = [32, 4], strides = [1, 1]} : vector<32x64xf32> to vector<32x4xf32>
    %15 = arith.addf %13, %14 : vector<32x4xf32>
    %16 = vector.extract_strided_slice %8 {offsets = [0, 16], sizes = [32, 4], strides = [1, 1]} : vector<32x64xf32> to vector<32x4xf32>
    %17 = vector.extract_strided_slice %8 {offsets = [0, 20], sizes = [32, 4], strides = [1, 1]} : vector<32x64xf32> to vector<32x4xf32>
    %18 = arith.addf %16, %17 : vector<32x4xf32>
    %19 = vector.extract_strided_slice %8 {offsets = [0, 24], sizes = [32, 4], strides = [1, 1]} : vector<32x64xf32> to vector<32x4xf32>
    %20 = arith.addf %18, %19 : vector<32x4xf32>
    %21 = vector.extract_strided_slice %8 {offsets = [0, 28], sizes = [32, 4], strides = [1, 1]} : vector<32x64xf32> to vector<32x4xf32>
    %22 = arith.addf %20, %21 : vector<32x4xf32>
    %23 = vector.extract_strided_slice %8 {offsets = [0, 32], sizes = [32, 4], strides = [1, 1]} : vector<32x64xf32> to vector<32x4xf32>
    %24 = vector.extract_strided_slice %8 {offsets = [0, 36], sizes = [32, 4], strides = [1, 1]} : vector<32x64xf32> to vector<32x4xf32>
    %25 = arith.addf %23, %24 : vector<32x4xf32>
    %26 = vector.extract_strided_slice %8 {offsets = [0, 40], sizes = [32, 4], strides = [1, 1]} : vector<32x64xf32> to vector<32x4xf32>
    %27 = arith.addf %25, %26 : vector<32x4xf32>
    %28 = vector.extract_strided_slice %8 {offsets = [0, 44], sizes = [32, 4], strides = [1, 1]} : vector<32x64xf32> to vector<32x4xf32>
    %29 = arith.addf %27, %28 : vector<32x4xf32>
    %30 = vector.extract_strided_slice %8 {offsets = [0, 48], sizes = [32, 4], strides = [1, 1]} : vector<32x64xf32> to vector<32x4xf32>
    %31 = vector.extract_strided_slice %8 {offsets = [0, 52], sizes = [32, 4], strides = [1, 1]} : vector<32x64xf32> to vector<32x4xf32>
    %32 = arith.addf %30, %31 : vector<32x4xf32>
    %33 = vector.extract_strided_slice %8 {offsets = [0, 56], sizes = [32, 4], strides = [1, 1]} : vector<32x64xf32> to vector<32x4xf32>
    %34 = arith.addf %32, %33 : vector<32x4xf32>
    %35 = vector.extract_strided_slice %8 {offsets = [0, 60], sizes = [32, 4], strides = [1, 1]} : vector<32x64xf32> to vector<32x4xf32>
    %36 = arith.addf %34, %35 : vector<32x4xf32>
    %37 = tpu.concatenate %15, %22, %29, %36 in 1 : vector<32x4xf32>, vector<32x4xf32>, vector<32x4xf32>, vector<32x4xf32> -> vector<32x16xf32>
    %c0_4 = arith.constant 0 : index
    %c0_5 = arith.constant 0 : index
    %38 = vector.load %arg3[%c0_4, %c0_5] : memref<32x16xf32, #tpu.memory_space<vmem>>, vector<32x16xf32>
    tpu.vector_store %arg3[%c0_4, %c0_5], %37 {strides = array<i32>} : memref<32x16xf32, #tpu.memory_space<vmem>>, vector<32x16xf32>,
    return
  }
  func.func @transform_0(%arg0: i32) -> (i32, i32) {
    %c0_i32 = arith.constant 0 : i32
    %c0_i32_0 = arith.constant 0 : i32
    return %arg0, %c0_i32 : i32, i32
  }
  func.func @transform_1(%arg0: i32) -> (i32, i32) {
    %c0_i32 = arith.constant 0 : i32
    %c0_i32_0 = arith.constant 0 : i32
    %c0_i32_1 = arith.constant 0 : i32
    return %c0_i32, %c0_i32_0 : i32, i32
  }
  func.func @transform_2(%arg0: i32) -> (i32, i32) {
    %c0_i32 = arith.constant 0 : i32
    %c0_i32_0 = arith.constant 0 : i32
    return %arg0, %c0_i32 : i32, i32
  }
}

</mosaic_0001>

<bundles_post_ra>
// kernel: tpu_custom_call.1
= control target key start
LH: loop header
LB: loop body
LE: loop exit
PB: predicated region body
PF: predicated region fallthrough
CT: control target
= control target key end

     0   :  { %vm17_vm0 = vcmask 130048   ;;  %s290_s20 = smov 124   ;;  %s291_s21 = smov 116   ;;  %s398_s1 = inlined_call_operand.vmem [shape: f32[16,64], index: 1, kind: input, shape index: {}]   ;;  %s399_s0 = inlined_call_operand.vmem [shape: f32[32,16], index: 0, kind: input, shape index: {}]   ;;  %s400_s2 = inlined_call_operand.vmem [shape: f32[32,16], index: 2, kind: output, shape index: {}]  }
   0x1   :  { %v16_v0 = vld [vmem:[%s398_s1 + $0x8] sm:$0xff]  ;;  %v15_v1 = vld [vmem:[%s398_s1] sm:$0xff]  ;;  %v13_v4 = vld [vmem:[%s399_s0 + $0x10] sm:$0xff]  ;;  %s292_s22 = smov 104   ;;  %s293_s23 = smov 92  }
   0x2   :  { %44 = vmatpush.msra.mxu0 %v16_v0  ;;  %262 = vmatpush.msra.mxu1 %v16_v0  ;;  %v11_v2 = vld [vmem:[%s399_s0] sm:$0xff]  ;;  %v12_v3 = vld [vmem:[%s399_s0 + $0x8] sm:$0xff]  ;;  %v14_v5 = vld [vmem:[%s399_s0 + $0x18] sm:$0xff]  ;;  %s289_s0 = smov 120  }
   0x3   :  { %263 = vmatpush.msra.mxu2 %v16_v0  ;;  %264 = vmatpush.msra.mxu3 %v16_v0 }
   0x4   :  { %45 = vmatpush.msra.mxu0 %v15_v1  ;;  %265 = vmatpush.msra.mxu1 %v15_v1 }
   0x5   :  { %266 = vmatpush.msra.mxu2 %v15_v1  ;;  %267 = vmatpush.msra.mxu3 %v15_v1 }
   0x6   :  { %254 = vmatmul.msk.f32.vlgmr.msra.gmra.mxu0 %vm17_vm0, %v11_v2  ;;  %255 = vmatmul.msk.f32.vlgmr.msra.gmra.mxu1 %vm17_vm0, %v12_v3 }
   0x7   :  { %256 = vmatmul.msk.f32.vlgmr.msra.gmra.mxu2 %vm17_vm0, %v13_v4  ;;  %257 = vmatmul.msk.f32.vlgmr.msra.gmra.mxu3 %vm17_vm0, %v14_v5 }
  0x83   :  { %v47_v6 = vpop.f32.mrf.mxu0  ;;  %v331_v7 = vpop.f32.mrf.mxu1 }
  0x84   :  { %v258_v8 = vmul.f32 -1.442695, %v47_v6  ;;  %v259_v9 = vmul.f32 -1.442695, %v331_v7 }
  0x86   :  { %273 = vpow2.f32 %v258_v8 }
  0x87   :  { %275 = vpow2.f32 %v259_v9 }
  0x8a   :  { %v334_v10 = vpop.f32.mrf.mxu2  ;;  %v336_v11 = vpop.f32.mrf.mxu3 }
  0x8b   :  { %v260_v12 = vmul.f32 -1.442695, %v334_v10  ;;  %v261_v13 = vmul.f32 -1.442695, %v336_v11 }
  0x8c   :  { %v274_v14 = vpop.eup %273 }
  0x8d   :  { %v276_v15 = vpop.eup %275  ;;  %v71_v16 = vadd.f32 1.0, %v274_v14  ;;  %277 = vpow2.f32 %v260_v12 }
  0x8e   :  { %v72_v17 = vadd.f32 1.0, %v276_v15  ;;  %279 = vpow2.f32 %v261_v13 }
  0x8f   :  { %281 = vrcp.f32 %v71_v16  ;;  %v86_v27 = vand.u32 2147483648, %v71_v16  ;;  %v84_v30 = vand.u32 2147483647, %v71_v16  ;;  %vm80_vm2 = vweird.f32 %v71_v16 }
  0x90   :  { %283 = vrcp.f32 %v72_v17  ;;  %vm95_vm4 = vweird.f32 %v72_v17  ;;  %v101_v35 = vand.u32 2147483648, %v72_v17  ;;  %v99_v44 = vand.u32 2147483647, %v72_v17 }
  0x91   :  { %v87_v34 = vor.u32 1.1754944e-38, %v86_v27  ;;  %vm85_vm5 = vcmp.eq.f32.partialorder %v84_v30, 8.507059e+37 }
  0x92   :  { %v102_v51 = vor.u32 1.1754944e-38, %v101_v35  ;;  %vm100_vm12 = vcmp.eq.f32.partialorder %v99_v44, 8.507059e+37 }
  0x93   :  { %v278_v18 = vpop.eup %277 }
  0x94   :  { %v280_v19 = vpop.eup %279  ;;  %v73_v20 = vadd.f32 1.0, %v278_v18 }
  0x95   :  { %v282_v21 = vpop.eup %281  ;;  %v340_v22 = vadd.f32 1.0, %v280_v19 }
  0x96   :  { %v284_v23 = vpop.eup %283  ;;  %v76_v24 = vmul.f32 %v282_v21, %v71_v16  ;;  %285 = vrcp.f32 %v73_v20  ;;  %vm81_vm1 = vweird.f32 %v282_v21  ;;  %vm110_vm7 = vweird.f32 %v73_v20 }
  0x97   :  { %v91_v25 = vmul.f32 %v284_v23, %v72_v17  ;;  %287 = vrcp.f32 %v340_v22  ;;  %vm82_vm3 = vmor %vm80_vm2, %vm81_vm1  ;;  %vm96_vm6 = vweird.f32 %v284_v23  ;;  %v116_v45 = vand.u32 2147483648, %v73_v20 }
  0x98   :  { %v77_v26 = vsub.f32 1.0, %v76_v24  ;;  %vm345_vm8 = vmor %vm95_vm4, %vm96_vm6  ;;  %v114_v48 = vand.u32 2147483647, %v73_v20  ;;  %vm125_vm10 = vweird.f32 %v340_v22  ;;  %v129_v55 = vand.u32 2147483647, %v340_v22 }
  0x99   :  { %v92_v28 = vsub.f32 1.0, %v91_v25  ;;  %v117_v54 = vor.u32 1.1754944e-38, %v116_v45  ;;  %v131_v56 = vand.u32 2147483648, %v340_v22  ;;  %vm231_vm2 = vcmask 31744  }
  0x9a   :  { %v78_v29 = vmul.f32 %v282_v21, %v77_v26  ;;  %vm115_vm14 = vcmp.eq.f32.partialorder %v114_v48, 8.507059e+37  ;;  %vm130_vm1 = vcmp.eq.f32.partialorder %v129_v55, 8.507059e+37  ;;  %vm236_vm4 = vcmask 64512  }
  0x9b   :  { %v93_v31 = vmul.f32 %v284_v23, %v92_v28  ;;  %v132_v63 = vor.u32 1.1754944e-38, %v131_v56 }
  0x9c   :  { %v286_v32 = vpop.eup %285  ;;  %v79_v33 = vadd.f32 %v282_v21, %v78_v29 }
  0x9d   :  { %v106_v36 = vmul.f32 %v286_v32, %v73_v20  ;;  %v288_v37 = vpop.eup %287  ;;  %v94_v39 = vadd.f32 %v284_v23, %v93_v31  ;;  %vm111_vm9 = vweird.f32 %v286_v32 }
  0x9e   :  { %v83_v38 = vsel %vm82_vm3, %v282_v21, %v79_v33  ;;  %v121_v42 = vmul.f32 %v288_v37, %v340_v22  ;;  %vm126_vm11 = vweird.f32 %v288_v37  ;;  %vm112_vm13 = vmor %vm110_vm7, %vm111_vm9  ;;  %vm241_vm3 = vcmask 97280  }
  0x9f   :  { %v88_v40 = vsel %vm85_vm5, %v87_v34, %v83_v38  ;;  %v107_v41 = vsub.f32 1.0, %v106_v36  ;;  %v98_v50 = vsel %vm345_vm8, %v284_v23, %v94_v39  ;;  %vm127_vm15 = vmor %vm125_vm10, %vm126_vm11 }
  0xa0   :  { %v135_v43 = vmul.f32 %v88_v40, %v47_v6  ;;  %v122_v49 = vsub.f32 1.0, %v121_v42  ;;  %v103_v57 = vsel %vm100_vm12, %v102_v51, %v98_v50 }
  0xa1   :  { %v108_v47 = vmul.f32 %v286_v32, %v107_v41  ;;  %v136_v62 = vmul.f32 %v103_v57, %v331_v7 }
  0xa2   :  { %159 = vrot.lane.b32.xlu2 %v135_v43, %s289_s0  ;;  %143 = vrot.lane.b32.xlu0 %v135_v43, %s290_s20  ;;  %v123_v53 = vmul.f32 %v288_v37, %v122_v49 }
  0xa3   :  { %v109_v52 = vadd.f32 %v286_v32, %v108_v47 }
  0xa4   :  { %v124_v59 = vadd.f32 %v288_v37, %v123_v53 }
  0xa5   :  { %v113_v58 = vsel %vm112_vm13, %v286_v32, %v109_v52 }
  0xa6   :  { %v118_v60 = vsel %vm115_vm14, %v117_v54, %v113_v58  ;;  %v128_v0 = vsel %vm127_vm15, %v288_v37, %v124_v59 }
  0xa7   :  { %v137_v61 = vmul.f32 %v118_v60, %v334_v10  ;;  %v133_v1 = vsel %vm130_vm1, %v132_v63, %v128_v0 }
  0xa8   :  { %v138_v2 = vmul.f32 %v133_v1, %v336_v11 }
  0xa9   :  { %147 = vrot.lane.b32.xlu1 %v137_v61, %s290_s20 }
  0xaa   :  { %161 = vrot.lane.b32.xlu2 %v136_v62, %s289_s0  ;;  %145 = vrot.lane.b32.xlu0 %v136_v62, %s290_s20 }
  0xb1   :  { %149 = vrot.lane.b32.xlu1 %v138_v2, %s290_s20 }
  0xb2   :  { %175 = vrot.lane.b32.xlu2 %v135_v43, %s291_s21  ;;  %163 = vrot.lane.b32.xlu0 %v137_v61, %s289_s0 }
  0xb9   :  { %165 = vrot.lane.b32.xlu1 %v138_v2, %s289_s0 }
  0xba   :  { %181 = vrot.lane.b32.xlu2 %v138_v2, %s291_s21  ;;  %177 = vrot.lane.b32.xlu0 %v136_v62, %s291_s21 }
  0xc1   :  { %179 = vrot.lane.b32.xlu1 %v137_v61, %s291_s21 }
  0xfc   :  { %v160_v3 = vpop.permute.xlu2 %159 }
 0x104   :  { %v162_v4 = vpop.permute.xlu2 %161 }
 0x10c   :  { %v176_v8 = vpop.permute.xlu2 %175 }
 0x114   :  { %v144_v5 = vpop.permute.xlu0 %143  ;;  %v182_v20 = vpop.permute.xlu2 %181 }
 0x115   :  { %v155_v6 = vadd.f32 %v144_v5, %v135_v43 }
 0x117   :  { %v171_v7 = vadd.f32 %v160_v3, %v155_v6 }
 0x119   :  { %v187_v9 = vadd.f32 %v176_v8, %v171_v7 }
 0x11b   :  { %v148_v10 = vpop.permute.xlu1 %147  ;;  %195 = vrot.lane.b32.xlu0 %v187_v9, %s291_s21 }
 0x11c   :  { %v146_v11 = vpop.permute.xlu0 %145  ;;  %v157_v23 = vadd.f32 %v148_v10, %v137_v61 }
 0x11d   :  { %v156_v14 = vadd.f32 %v146_v11, %v136_v62 }
 0x11f   :  { %v172_v17 = vadd.f32 %v162_v4, %v156_v14 }
 0x123   :  { %v150_v12 = vpop.permute.xlu1 %149 }
 0x124   :  { %v164_v13 = vpop.permute.xlu0 %163  ;;  %v158_v15 = vadd.f32 %v150_v12, %v138_v2 }
 0x125   :  { %v173_v25 = vadd.f32 %v164_v13, %v157_v23 }
 0x12b   :  { %v166_v16 = vpop.permute.xlu1 %165 }
 0x12c   :  { %v174_v18 = vadd.f32 %v166_v16, %v158_v15  ;;  %v178_v19 = vpop.permute.xlu0 %177 }
 0x12d   :  { %v188_v21 = vadd.f32 %v178_v19, %v172_v17 }
 0x12e   :  { %v190_v22 = vadd.f32 %v182_v20, %v174_v18 }
 0x12f   :  { %209 = vrot.lane.b32.xlu2 %v188_v21, %s292_s22  ;;  %197 = vrot.lane.b32.xlu1 %v188_v21, %s291_s21 }
 0x130   :  { %201 = vrot.lane.b32.xlu0 %v190_v22, %s291_s21 }
 0x133   :  { %v180_v24 = vpop.permute.xlu1 %179 }
 0x134   :  { %v189_v26 = vadd.f32 %v180_v24, %v173_v25 }
 0x137   :  { %219 = vrot.lane.b32.xlu2 %v187_v9, %s293_s23  ;;  %207 = vrot.lane.b32.xlu1 %v187_v9, %s292_s22 }
 0x138   :  { %211 = vrot.lane.b32.xlu0 %v189_v26, %s292_s22 }
 0x13f   :  { %199 = vrot.lane.b32.xlu2 %v189_v26, %s291_s21  ;;  %213 = vrot.lane.b32.xlu1 %v190_v22, %s292_s22 }
 0x140   :  { %221 = vrot.lane.b32.xlu0 %v188_v21, %s293_s23 }
 0x147   :  { %225 = vrot.lane.b32.xlu2 %v190_v22, %s293_s23  ;;  %223 = vrot.lane.b32.xlu1 %v189_v26, %s293_s23 }
 0x189   :  { %v210_v27 = vpop.permute.xlu2 %209 }
 0x18d   :  { %v196_v28 = vpop.permute.xlu0 %195 }
 0x18e   :  { %v232_v33 = vsel %vm231_vm2, %v187_v9, %v196_v28 }
 0x191   :  { %v220_v29 = vpop.permute.xlu2 %219 }
 0x199   :  { %v200_v32 = vpop.permute.xlu2 %199 }
 0x19a   :  { %v234_v47 = vsel %vm231_vm2, %v189_v26, %v200_v32 }
 0x1a1   :  { %v198_v30 = vpop.permute.xlu1 %197  ;;  %v226_v41 = vpop.permute.xlu2 %225 }
 0x1a2   :  { %v202_v31 = vpop.permute.xlu0 %201  ;;  %v233_v38 = vsel %vm231_vm2, %v188_v21, %v198_v30 }
 0x1a3   :  { %v235_v39 = vsel %vm231_vm2, %v190_v22, %v202_v31  ;;  %v238_v43 = vsel %vm236_vm4, %v233_v38, %v210_v27 }
 0x1a9   :  { %v208_v34 = vpop.permute.xlu1 %207 }
 0x1aa   :  { %v237_v35 = vsel %vm236_vm4, %v232_v33, %v208_v34  ;;  %v212_v36 = vpop.permute.xlu0 %211 }
 0x1ab   :  { %v242_v37 = vsel %vm241_vm3, %v237_v35, %v220_v29  ;;  %v239_v48 = vsel %vm236_vm4, %v234_v47, %v212_v36 }
 0x1ac   :  { %246 = vst.msk [vmem:[%s400_s2] sm:$0xff] %vm17_vm0, %v242_v37 }
 0x1b1   :  { %v214_v40 = vpop.permute.xlu1 %213 }
 0x1b2   :  { %v240_v42 = vsel %vm236_vm4, %v235_v39, %v214_v40  ;;  %v222_v44 = vpop.permute.xlu0 %221 }
 0x1b3   :  { %v245_v45 = vsel %vm241_vm3, %v240_v42, %v226_v41  ;;  %v243_v46 = vsel %vm241_vm3, %v238_v43, %v222_v44 }
 0x1b4   :  { %249 = vst.msk [vmem:[%s400_s2 + $0x18] sm:$0xff] %vm17_vm0, %v245_v45 }
 0x1b5   :  { %247 = vst.msk [vmem:[%s400_s2 + $0x8] sm:$0xff] %vm17_vm0, %v243_v46 }
 0x1b9   :  { %v224_v49 = vpop.permute.xlu1 %223 }
 0x1ba   :  { %v244_v50 = vsel %vm241_vm3, %v239_v48, %v224_v49 }
 0x1bb   :  { %248 = vst.msk [vmem:[%s400_s2 + $0x10] sm:$0xff] %vm17_vm0, %v244_v50 }

</bundles_post_ra>
